<compile_context>
chip_gen: v6e
topology: v6e:2x2x1
jax: 0.10.0
libtpu: 0.0.40
codegen_flags: <defaults>
</compile_context>

<pallas_src>
import jax
import jax.numpy as jnp
from jax.experimental import pallas as pl
from jax.experimental.pallas import tpu as pltpu

HIDDEN = 512
_LANE = 128       # padded action dim; keep lane-dense at 128 (do NOT pad to 256)
_SUB = 8          # f32 sublane multiple
_MAX_TILE = 512   # max batch rows per grid step (large eval batches)
_SPLIT_AT = 32    # batches >= this get >= 2 grid steps (v7x megacore)
_NEG = -1.0e30    # padded-action bias; bf16-representable (not -inf)


def _round_up(n, m):
    return max(m, -(-n // m) * m)


def _choose_tiles(B):
    """Return (padded_batch, batch_tile)."""
    B8 = _round_up(B, _SUB)
    if B8 < _SPLIT_AT:
        return B8, B8                       # latency path: single tile, grid=1
    bt = min(_MAX_TILE, _round_up((B8 + 1) // 2, _SUB))
    B_p = _round_up(B8, bt)
    return B_p, bt


def _vmem_limit(bt, n_obs, prepped):
    w_bytes = sum(int(w.size) * w.dtype.itemsize for w in prepped)
    buf = (2 * bt * n_obs * 4                  # x tiles (double-buffered)
           + 2 * bt * (_LANE * 2 + 4 + 4)      # q (bf16) + argmax + max tiles
           + 2 * w_bytes                       # weight blocks (default buffering)
           + 8 * bt * HIDDEN * 4)              # f32/bf16 intermediates headroom
    return int(min(max(2 * buf, 4 << 20), 48 << 20))


def _dqn_kernel(x_ref, w1_ref, b1_ref, w2_ref, b2_ref, w3_ref, b3_ref,
                q_ref, act_ref, max_ref):
    x = x_ref[...]                 # (bt, n_obs) f32
    w1 = w1_ref[...]               # (n_obs, HIDDEN) f32
    n_obs = x.shape[1]

    # ---- Layer 1. n_obs is tiny/unaligned, so use VPU rank-1 MACs (f32);
    #      fall back to the MXU when the obs dim happens to be sublane-aligned.
    if n_obs >= _SUB and n_obs % _SUB == 0:
        acc = jnp.dot(x, w1, preferred_element_type=jnp.float32)
    else:
        acc = x[:, 0:1] * w1[0:1, :]
        for k in range(1, n_obs):
            acc = acc + x[:, k:k + 1] * w1[k:k + 1, :]
    # bias + ReLU in bf16 (f32 accumulation already done)
    h1 = jnp.maximum(acc.astype(jnp.bfloat16) + b1_ref[...], 0)

    # ---- Layer 2: bf16 x bf16 MXU matmul, f32 accumulation.
    h2 = jnp.dot(h1, w2_ref[...], preferred_element_type=jnp.float32)
    h2 = jnp.maximum(h2.astype(jnp.bfloat16) + b2_ref[...], 0)

    # ---- Layer 3: bf16 x bf16 MXU matmul, f32 accumulation + f32 bias
    #      (padded action lanes get -1e30 bias; their weight columns are zero).
    q = jnp.dot(h2, w3_ref[...], preferred_element_type=jnp.float32) + b3_ref[...]

    # Fused epilogue: bf16 Q-values, greedy action, row-max Q.
    q_ref[...] = q.astype(jnp.bfloat16)
    qmax = jnp.max(q, axis=-1, keepdims=True)
    max_ref[...] = qmax
    lane = jax.lax.broadcasted_iota(jnp.int32, q.shape, 1)
    act_ref[...] = jnp.min(jnp.where(q >= qmax, lane, q.shape[1]),
                           axis=-1, keepdims=True)


def prepare_params(params, n_observations, n_actions):
    """One-time weight prep (do at init / target-network-update time).

    Weights are (in_features, out_features) so y = x @ W + b, i.e. the
    transpose of PyTorch nn.Linear's (out, in) weight.
    """
    w1, b1, w2, b2, w3, b3 = params
    assert n_actions <= _LANE
    w1_p = w1.astype(jnp.float32)                              # tiny; VPU layer
    b1_p = b1.reshape(1, HIDDEN).astype(jnp.bfloat16)
    w2_p = w2.astype(jnp.bfloat16)
    b2_p = b2.reshape(1, HIDDEN).astype(jnp.bfloat16)
    w3_p = jnp.zeros((HIDDEN, _LANE), jnp.bfloat16).at[:, :n_actions].set(
        w3.astype(jnp.bfloat16))
    b3_p = jnp.full((1, _LANE), _NEG, jnp.float32).at[0, :n_actions].set(
        b3.astype(jnp.float32))
    return (w1_p, b1_p, w2_p, b2_p, w3_p, b3_p)


@jax.jit
def dqn_forward(x, prepped):
    """x: (B, n_observations) f32.

    Returns:
      q_padded : (B_p, 128) bf16 Q-values (lanes >= n_actions ~ -1e30,
                 rows >= B are padding garbage)
      greedy   : (B_p, 1) int32 argmax_a Q
      q_max    : (B_p, 1) f32   max_a Q
    """
    w1_p, b1_p, w2_p, b2_p, w3_p, b3_p = prepped
    B, n_obs = x.shape
    x = x.astype(jnp.float32)

    B_p, bt = _choose_tiles(B)
    if B_p != B:
        x = jnp.pad(x, ((0, B_p - B), (0, 0)))
    n_tiles = B_p // bt
    act_p = w3_p.shape[1]

    const = lambda shape: pl.BlockSpec(shape, lambda i: (0, 0))  # VMEM-resident

    return pl.pallas_call(
        _dqn_kernel,
        out_shape=(
            jax.ShapeDtypeStruct((B_p, act_p), jnp.bfloat16),
            jax.ShapeDtypeStruct((B_p, 1), jnp.int32),
            jax.ShapeDtypeStruct((B_p, 1), jnp.float32),
        ),
        grid=(n_tiles,),
        in_specs=[
            pl.BlockSpec((bt, n_obs), lambda i: (i, 0)),
            const((n_obs, HIDDEN)), const((1, HIDDEN)),
            const((HIDDEN, HIDDEN)), const((1, HIDDEN)),
            const((HIDDEN, act_p)), const((1, act_p)),
        ],
        out_specs=(
            pl.BlockSpec((bt, act_p), lambda i: (i, 0)),
            pl.BlockSpec((bt, 1), lambda i: (i, 0)),
            pl.BlockSpec((bt, 1), lambda i: (i, 0)),
        ),
        compiler_params=pltpu.CompilerParams(
            dimension_semantics=("parallel",),
            vmem_limit_bytes=_vmem_limit(bt, n_obs, prepped)),
    )(x, w1_p, b1_p, w2_p, b2_p, w3_p, b3_p)


def init_params(key, n_observations, n_actions):
    """Deterministic init mimicking nn.Linear's uniform(-1/sqrt(fan_in), ...)."""
    ks = jax.random.split(key, 6)

    def lin(kw, kb, fan_in, fan_out):
        bound = 1.0 / jnp.sqrt(jnp.float32(fan_in))
        w = jax.random.uniform(kw, (fan_in, fan_out), jnp.float32, -bound, bound)
        b = jax.random.uniform(kb, (fan_out,), jnp.float32, -bound, bound)
        return w, b

    w1, b1 = lin(ks[0], ks[1], n_observations, HIDDEN)
    w2, b2 = lin(ks[2], ks[3], HIDDEN, HIDDEN)
    w3, b3 = lin(ks[4], ks[5], HIDDEN, n_actions)
    return (w1, b1, w2, b2, w3, b3)


def _reference(x, params):
    """Pure-JAX reference mirroring the kernel numerics (bf16 weights/acts,
    f32 accumulation)."""
    w1, b1, w2, b2, w3, b3 = params
    bf = lambda a: a.astype(jnp.bfloat16)
    h1 = jnp.maximum(bf(x @ w1) + bf(b1), 0)
    h2 = jnp.maximum(
        bf(jnp.dot(h1, bf(w2), preferred_element_type=jnp.float32)) + bf(b2), 0)
    return jnp.dot(h2, bf(w3), preferred_element_type=jnp.float32) + b3


def _check(x, params, n_actions, atol=2e-2):
    B = x.shape[0]
    prepped = prepare_params(params, x.shape[1], n_actions)
    q_pad, greedy, qmax = dqn_forward(x, prepped)
    jax.block_until_ready((q_pad, greedy, qmax))

    q = q_pad[:B, :n_actions].astype(jnp.float32)
    greedy = greedy[:B, 0]
    qmax = qmax[:B, 0]
    ref = _reference(x, params)
    ref_max = jnp.max(ref, axis=-1)

    assert q.shape == (B, n_actions)
    err = float(jnp.max(jnp.abs(q - ref)))
    assert jnp.allclose(q, ref, atol=atol, rtol=atol), err
    assert jnp.allclose(qmax, ref_max, atol=atol, rtol=atol)
    # Greedy action is valid (padded lanes never win) and near-optimal vs ref.
    assert jnp.all(greedy >= 0) and jnp.all(greedy < n_actions)
    chosen = jnp.take_along_axis(ref, greedy[:, None], axis=1)[:, 0]
    assert jnp.all(chosen >= ref_max - atol)
    # Padded action lanes stay hugely negative (safe for argmax/max only).
    assert jnp.all(q_pad[:B, n_actions:].astype(jnp.float32) < -1e20)


if __name__ == "__main__":
    key = jax.random.PRNGKey(0)
    k_x1, k_x2, k_p = jax.random.split(key, 3)

    n_observations = 6   # QubeSwingup observation dim (synthetic)
    n_actions = 5        # discrete action count (synthetic)

    params = init_params(k_p, n_observations, n_actions)

    # Acting path: tiny batch, single tile, no K/lane prep on x.
    x_small = jax.random.normal(k_x1, (2, n_observations), jnp.float32)
    _check(x_small, params, n_actions)

    # Training/eval path: batch >= 32 -> row padding + 2 "parallel" grid steps.
    x_large = jax.random.normal(k_x2, (40, n_observations), jnp.float32)
    _check(x_large, params, n_actions)

    print("KERNEL_OK")
</pallas_src>

<mosaic_0001>
module attributes {stable_mosaic.version = 11 : i64} {
  func.func @_dqn_kernel(%arg0: i32, %arg1: memref<8x6xf32, #tpu.memory_space<vmem>>, %arg2: memref<6x512xf32, #tpu.memory_space<vmem>>, %arg3: memref<1x512xbf16, #tpu.memory_space<vmem>>, %arg4: memref<512x512xbf16, #tpu.memory_space<vmem>>, %arg5: memref<1x512xbf16, #tpu.memory_space<vmem>>, %arg6: memref<512x128xbf16, #tpu.memory_space<vmem>>, %arg7: memref<1x128xf32, #tpu.memory_space<vmem>>, %arg8: memref<8x128xbf16, #tpu.memory_space<vmem>>, %arg9: memref<8x1xi32, #tpu.memory_space<vmem>>, %arg10: memref<8x1xf32, #tpu.memory_space<vmem>>) attributes {dimension_semantics = [#tpu.dimension_semantics<parallel>], iteration_bounds = array<i64: 1>, scalar_prefetch = 0 : i64, scratch_operands = 0 : i64, tpu.core_type = #tpu.core_type<tc>, window_params = [{transform_indices = @transform_0, window_bounds = array<i64: 8, 6>}, {pipeline_mode = #tpu.pipeline_mode<synchronous>, transform_indices = @transform_1, window_bounds = array<i64: 6, 512>}, {pipeline_mode = #tpu.pipeline_mode<synchronous>, transform_indices = @transform_2, window_bounds = array<i64: 1, 512>}, {pipeline_mode = #tpu.pipeline_mode<synchronous>, transform_indices = @transform_3, window_bounds = array<i64: 512, 512>}, {pipeline_mode = #tpu.pipeline_mode<synchronous>, transform_indices = @transform_4, window_bounds = array<i64: 1, 512>}, {pipeline_mode = #tpu.pipeline_mode<synchronous>, transform_indices = @transform_5, window_bounds = array<i64: 512, 128>}, {pipeline_mode = #tpu.pipeline_mode<synchronous>, transform_indices = @transform_6, window_bounds = array<i64: 1, 128>}, {transform_indices = @transform_7, window_bounds = array<i64: 8, 128>}, {transform_indices = @transform_8, window_bounds = array<i64: 8, 1>}, {transform_indices = @transform_9, window_bounds = array<i64: 8, 1>}]} {
    %c0 = arith.constant 0 : index
    %c0_0 = arith.constant 0 : index
    %0 = vector.load %arg1[%c0, %c0_0] : memref<8x6xf32, #tpu.memory_space<vmem>>, vector<8x6xf32>
    %c0_1 = arith.constant 0 : index
    %c0_2 = arith.constant 0 : index
    %1 = vector.load %arg2[%c0_1, %c0_2] : memref<6x512xf32, #tpu.memory_space<vmem>>, vector<6x512xf32>
    %2 = vector.extract_strided_slice %0 {offsets = [0, 0], sizes = [8, 1], strides = [1, 1]} : vector<8x6xf32> to vector<8x1xf32>
    %3 = vector.extract_strided_slice %1 {offsets = [0, 0], sizes = [1, 512], strides = [1, 1]} : vector<6x512xf32> to vector<1x512xf32>
    %4 = vector.broadcast %2 : vector<8x1xf32> to vector<8x512xf32>
    %5 = vector.broadcast %3 : vector<1x512xf32> to vector<8x512xf32>
    %6 = arith.mulf %4, %5 : vector<8x512xf32>
    %7 = vector.extract_strided_slice %0 {offsets = [0, 1], sizes = [8, 1], strides = [1, 1]} : vector<8x6xf32> to vector<8x1xf32>
    %8 = vector.extract_strided_slice %1 {offsets = [1, 0], sizes = [1, 512], strides = [1, 1]} : vector<6x512xf32> to vector<1x512xf32>
    %9 = vector.broadcast %7 : vector<8x1xf32> to vector<8x512xf32>
    %10 = vector.broadcast %8 : vector<1x512xf32> to vector<8x512xf32>
    %11 = arith.mulf %9, %10 : vector<8x512xf32>
    %12 = arith.addf %6, %11 : vector<8x512xf32>
    %13 = vector.extract_strided_slice %0 {offsets = [0, 2], sizes = [8, 1], strides = [1, 1]} : vector<8x6xf32> to vector<8x1xf32>
    %14 = vector.extract_strided_slice %1 {offsets = [2, 0], sizes = [1, 512], strides = [1, 1]} : vector<6x512xf32> to vector<1x512xf32>
    %15 = vector.broadcast %13 : vector<8x1xf32> to vector<8x512xf32>
    %16 = vector.broadcast %14 : vector<1x512xf32> to vector<8x512xf32>
    %17 = arith.mulf %15, %16 : vector<8x512xf32>
    %18 = arith.addf %12, %17 : vector<8x512xf32>
    %19 = vector.extract_strided_slice %0 {offsets = [0, 3], sizes = [8, 1], strides = [1, 1]} : vector<8x6xf32> to vector<8x1xf32>
    %20 = vector.extract_strided_slice %1 {offsets = [3, 0], sizes = [1, 512], strides = [1, 1]} : vector<6x512xf32> to vector<1x512xf32>
    %21 = vector.broadcast %19 : vector<8x1xf32> to vector<8x512xf32>
    %22 = vector.broadcast %20 : vector<1x512xf32> to vector<8x512xf32>
    %23 = arith.mulf %21, %22 : vector<8x512xf32>
    %24 = arith.addf %18, %23 : vector<8x512xf32>
    %25 = vector.extract_strided_slice %0 {offsets = [0, 4], sizes = [8, 1], strides = [1, 1]} : vector<8x6xf32> to vector<8x1xf32>
    %26 = vector.extract_strided_slice %1 {offsets = [4, 0], sizes = [1, 512], strides = [1, 1]} : vector<6x512xf32> to vector<1x512xf32>
    %27 = vector.broadcast %25 : vector<8x1xf32> to vector<8x512xf32>
    %28 = vector.broadcast %26 : vector<1x512xf32> to vector<8x512xf32>
    %29 = arith.mulf %27, %28 : vector<8x512xf32>
    %30 = arith.addf %24, %29 : vector<8x512xf32>
    %31 = vector.extract_strided_slice %0 {offsets = [0, 5], sizes = [8, 1], strides = [1, 1]} : vector<8x6xf32> to vector<8x1xf32>
    %32 = vector.extract_strided_slice %1 {offsets = [5, 0], sizes = [1, 512], strides = [1, 1]} : vector<6x512xf32> to vector<1x512xf32>
    %33 = vector.broadcast %31 : vector<8x1xf32> to vector<8x512xf32>
    %34 = vector.broadcast %32 : vector<1x512xf32> to vector<8x512xf32>
    %35 = arith.mulf %33, %34 : vector<8x512xf32>
    %36 = arith.addf %30, %35 : vector<8x512xf32>
    %37 = arith.truncf %36 : vector<8x512xf32> to vector<8x512xbf16>
    %c0_3 = arith.constant 0 : index
    %c0_4 = arith.constant 0 : index
    %38 = vector.load %arg3[%c0_3, %c0_4] : memref<1x512xbf16, #tpu.memory_space<vmem>>, vector<1x512xbf16>
    %39 = vector.broadcast %38 : vector<1x512xbf16> to vector<8x512xbf16>
    %40 = arith.addf %37, %39 : vector<8x512xbf16>
    %cst = arith.constant 0.000000e+00 : bf16
    %41 = vector.broadcast %cst : bf16 to vector<8x512xbf16>
    %42 = arith.maximumf %40, %41 : vector<8x512xbf16>
    %c0_5 = arith.constant 0 : index
    %c0_6 = arith.constant 0 : index
    %43 = vector.load %arg4[%c0_5, %c0_6] : memref<512x512xbf16, #tpu.memory_space<vmem>>, vector<512x512xbf16>
    %cst_7 = arith.constant dense<0.000000e+00> : vector<8x512xf32>
    %44 = tpu.matmul %42, %43, %cst_7 {dimension_numbers = #tpu.dot_dimension_numbers<[1], [0], [0], [1], [0, 0, 1, 1], [], []>} : vector<8x512xbf16>, vector<512x512xbf16>, vector<8x512xf32> -> vector<8x512xf32>
    %45 = arith.truncf %44 : vector<8x512xf32> to vector<8x512xbf16>
    %c0_8 = arith.constant 0 : index
    %c0_9 = arith.constant 0 : index
    %46 = vector.load %arg5[%c0_8, %c0_9] : memref<1x512xbf16, #tpu.memory_space<vmem>>, vector<1x512xbf16>
    %47 = vector.broadcast %46 : vector<1x512xbf16> to vector<8x512xbf16>
    %48 = arith.addf %45, %47 : vector<8x512xbf16>
    %cst_10 = arith.constant 0.000000e+00 : bf16
    %49 = vector.broadcast %cst_10 : bf16 to vector<8x512xbf16>
    %50 = arith.maximumf %48, %49 : vector<8x512xbf16>
    %c0_11 = arith.constant 0 : index
    %c0_12 = arith.constant 0 : index
    %51 = vector.load %arg6[%c0_11, %c0_12] : memref<512x128xbf16, #tpu.memory_space<vmem>>, vector<512x128xbf16>
    %cst_13 = arith.constant dense<0.000000e+00> : vector<8x128xf32>
    %52 = tpu.matmul %50, %51, %cst_13 {dimension_numbers = #tpu.dot_dimension_numbers<[1], [0], [0], [1], [0, 0, 1, 1], [], []>} : vector<8x512xbf16>, vector<512x128xbf16>, vector<8x128xf32> -> vector<8x128xf32>
    %c0_14 = arith.constant 0 : index
    %c0_15 = arith.constant 0 : index
    %53 = vector.load %arg7[%c0_14, %c0_15] : memref<1x128xf32, #tpu.memory_space<vmem>>, vector<1x128xf32>
    %54 = vector.broadcast %53 : vector<1x128xf32> to vector<8x128xf32>
    %55 = arith.addf %52, %54 : vector<8x128xf32>
    %56 = arith.truncf %55 : vector<8x128xf32> to vector<8x128xbf16>
    %c0_16 = arith.constant 0 : index
    %c0_17 = arith.constant 0 : index
    %57 = vector.load %arg8[%c0_16, %c0_17] : memref<8x128xbf16, #tpu.memory_space<vmem>>, vector<8x128xbf16>
    tpu.vector_store %arg8[%c0_16, %c0_17], %56 {strides = array<i32>} : memref<8x128xbf16, #tpu.memory_space<vmem>>, vector<8x128xbf16>,
    %cst_18 = arith.constant dense<0xFF800000> : vector<8xf32>
    %58 = vector.multi_reduction <maximumf>, %55, %cst_18 [1] : vector<8x128xf32> to vector<8xf32>
    %59 = vector.shape_cast %58 : vector<8xf32> to vector<8x1xf32>
    %c0_19 = arith.constant 0 : index
    %c0_20 = arith.constant 0 : index
    %60 = vector.load %arg10[%c0_19, %c0_20] : memref<8x1xf32, #tpu.memory_space<vmem>>, vector<8x1xf32>
    tpu.vector_store %arg10[%c0_19, %c0_20], %59 {strides = array<i32>} : memref<8x1xf32, #tpu.memory_space<vmem>>, vector<8x1xf32>,
    %61 = tpu.iota {dimensions = array<i32: 1>} : vector<8x128xi32>
    %62 = vector.broadcast %59 : vector<8x1xf32> to vector<8x128xf32>
    %63 = arith.cmpf oge, %55, %62 : vector<8x128xf32>
    %c128_i32 = arith.constant 128 : i32
    %64 = vector.broadcast %c128_i32 : i32 to vector<8x128xi32>
    %65 = arith.select %63, %61, %64 : vector<8x128xi1>, vector<8x128xi32>
    %cst_21 = arith.constant dense<2147483647> : vector<8xi32>
    %66 = vector.multi_reduction <minsi>, %65, %cst_21 [1] : vector<8x128xi32> to vector<8xi32>
    %67 = vector.shape_cast %66 : vector<8xi32> to vector<8x1xi32>
    %c0_22 = arith.constant 0 : index
    %c0_23 = arith.constant 0 : index
    %68 = vector.load %arg9[%c0_22, %c0_23] : memref<8x1xi32, #tpu.memory_space<vmem>>, vector<8x1xi32>
    tpu.vector_store %arg9[%c0_22, %c0_23], %67 {strides = array<i32>} : memref<8x1xi32, #tpu.memory_space<vmem>>, vector<8x1xi32>,
    return
  }
  func.func @transform_0(%arg0: i32) -> (i32, i32) {
    %c0_i32 = arith.constant 0 : i32
    %c0_i32_0 = arith.constant 0 : i32
    return %arg0, %c0_i32 : i32, i32
  }
  func.func @transform_1(%arg0: i32) -> (i32, i32) {
    %c0_i32 = arith.constant 0 : i32
    %c0_i32_0 = arith.constant 0 : i32
    %c0_i32_1 = arith.constant 0 : i32
    return %c0_i32, %c0_i32_0 : i32, i32
  }
  func.func @transform_2(%arg0: i32) -> (i32, i32) {
    %c0_i32 = arith.constant 0 : i32
    %c0_i32_0 = arith.constant 0 : i32
    %c0_i32_1 = arith.constant 0 : i32
    return %c0_i32, %c0_i32_0 : i32, i32
  }
  func.func @transform_3(%arg0: i32) -> (i32, i32) {
    %c0_i32 = arith.constant 0 : i32
    %c0_i32_0 = arith.constant 0 : i32
    %c0_i32_1 = arith.constant 0 : i32
    return %c0_i32, %c0_i32_0 : i32, i32
  }
  func.func @transform_4(%arg0: i32) -> (i32, i32) {
    %c0_i32 = arith.constant 0 : i32
    %c0_i32_0 = arith.constant 0 : i32
    %c0_i32_1 = arith.constant 0 : i32
    return %c0_i32, %c0_i32_0 : i32, i32
  }
  func.func @transform_5(%arg0: i32) -> (i32, i32) {
    %c0_i32 = arith.constant 0 : i32
    %c0_i32_0 = arith.constant 0 : i32
    %c0_i32_1 = arith.constant 0 : i32
    return %c0_i32, %c0_i32_0 : i32, i32
  }
  func.func @transform_6(%arg0: i32) -> (i32, i32) {
    %c0_i32 = arith.constant 0 : i32
    %c0_i32_0 = arith.constant 0 : i32
    %c0_i32_1 = arith.constant 0 : i32
    return %c0_i32, %c0_i32_0 : i32, i32
  }
  func.func @transform_7(%arg0: i32) -> (i32, i32) {
    %c0_i32 = arith.constant 0 : i32
    %c0_i32_0 = arith.constant 0 : i32
    return %arg0, %c0_i32 : i32, i32
  }
  func.func @transform_8(%arg0: i32) -> (i32, i32) {
    %c0_i32 = arith.constant 0 : i32
    %c0_i32_0 = arith.constant 0 : i32
    return %arg0, %c0_i32 : i32, i32
  }
  func.func @transform_9(%arg0: i32) -> (i32, i32) {
    %c0_i32 = arith.constant 0 : i32
    %c0_i32_0 = arith.constant 0 : i32
    return %arg0, %c0_i32 : i32, i32
  }
}

</mosaic_0001>

<bundles_post_ra>
// kernel: dqn_forward.1
= control target key start
LH: loop header
LB: loop body
LE: loop exit
PB: predicated region body
PF: predicated region fallthrough
CT: control target
= control target key end

     0   :  { %15 = vsyncpa [#allocation3], 0  ;;  %s2434_s0 = inlined_call_operand.vmem [shape: f32[8,6], index: 0, kind: input, shape index: {}]   ;;  %s2435_s1 = inlined_call_operand.hbm [shape: f32[6,512], index: 1, kind: input, shape index: {}]   ;;  %s2436_s2 = inlined_call_operand.vmem [shape: bf16[1,512], index: 2, kind: input, shape index: {}]   ;;  %s2437_s3 = inlined_call_operand.hbm [shape: bf16[512,512], index: 3, kind: input, shape index: {}]   ;;  %s2438_s4 = inlined_call_operand.vmem [shape: bf16[1,512], index: 4, kind: input, shape index: {}]   ;;  %s2439_s5 = inlined_call_operand.hbm [shape: bf16[512,128], index: 5, kind: input, shape index: {}]   ;;  %s2440_s6 = inlined_call_operand.vmem [shape: f32[1,128], index: 6, kind: input, shape index: {}]   ;;  %s2441_s7 = inlined_call_operand.hbm [shape: bf16[8,128], index: 7, kind: output, shape index: {0}]   ;;  %s2442_s8 = inlined_call_operand.vmem [shape: s32[8,1], index: 8, kind: output, shape index: {1}]   ;;  %s2443_s9 = inlined_call_operand.vmem [shape: f32[8,1], index: 9, kind: output, shape index: {2}]  }
   0x1   :  { %16 = vsyncpa [#allocation6], 0 }
   0x2   :  { %17 = vsyncpa [#allocation4], 0  ;;  %s2234_s30 = smov [#allocation5]  }
   0x3   :  { %s37_s10 = sshll.u32 %s2234_s30, 4  ;;  %s38_s10 = int_to_ptr.vmem [resolvable:$true] %s37_s10 }
   0x4   :  { %s2156_s11 = scalar_lea.vmem %s38_s10, 16384  ;;  %p2161_p1 = scmp.lt.s32.totalorder %s38_s10, %s38_s10 }
   0x5   :  { %p2157_p0 = scmp.ne.s32.totalorder %s38_s10, %s2156_s11  ;;  %p2162_p2 = scmp.lt.s32.totalorder %s2156_s11, %s2156_s11 }
   0x7   :  { %p2163_p3 = por %p2162_p2, %p2161_p1 }
   0x9   :  { %p2164_p4 = pnand %p2163_p3, %p2157_p0 }
   0xb   :  { %2167 = shalt.err (!%p2164_p4)
}
   0xc   :  { %s2235_s12 = smov 256   ;;  %s2236_s13 = smov 16  }
   0xd   :  { %43 = dma.hbm_to_vmem [thread:$0]  %s2437_s3, 16384, %s38_s10, [#allocation6], %s2235_s12, %s2235_s12, %s2236_s13  }
   0xe   :  { %s2237_s16 = smov [#allocation2]   ;;  %s2238_s18 = smov [#allocation7]  }
   0xf   :  { %s26_s17 = sshll.u32 %s2237_s16, 4  ;;  %s51_s19 = sshll.u32 %s2238_s18, 4  ;;  %s27_s17 = int_to_ptr.vmem [resolvable:$true] %s26_s17  ;;  %s52_s19 = int_to_ptr.vmem [resolvable:$true] %s51_s19 }
  0x10   :  { %s2176_s20 = scalar_lea.vmem %s27_s17, 512  ;;  %p2181_p6 = scmp.lt.s32.totalorder %s27_s17, %s27_s17 }
  0x11   :  { %p2177_p5 = scmp.ne.s32.totalorder %s27_s17, %s2176_s20  ;;  %p2182_p7 = scmp.lt.s32.totalorder %s2176_s20, %s2176_s20 }
  0x13   :  { %p2183_p8 = por %p2182_p7, %p2181_p6 }
  0x15   :  { %p2184_p9 = pnand %p2183_p8, %p2177_p5 }
  0x17   :  { %2187 = shalt.err (!%p2184_p9)
}
  0x18   :  { %29 = dma.hbm_to_vmem [thread:$0]  %s2435_s1, 512, %s27_s17, [#allocation3]  }
  0x19   :  { %s2196_s23 = scalar_lea.vmem %s52_s19, 4096  ;;  %p2201_p11 = scmp.lt.s32.totalorder %s52_s19, %s52_s19 }
  0x1a   :  { %p2197_p10 = scmp.ne.s32.totalorder %s52_s19, %s2196_s23  ;;  %p2202_p12 = scmp.lt.s32.totalorder %s2196_s23, %s2196_s23 }
  0x1c   :  { %p2203_p13 = por %p2202_p12, %p2201_p11 }
  0x1e   :  { %p2204_p0 = pnand %p2203_p13, %p2197_p10 }
  0x20   :  { %2207 = shalt.err (!%p2204_p0)
}
  0x21   :  { %s2239_s3 = smov 64   ;;  %s2240_s24 = smov 4  }
  0x22   :  { %57 = dma.hbm_to_vmem [thread:$0]  %s2439_s5, 4096, %s52_s19, [#allocation6], %s2239_s3, %s2239_s3, %s2240_s24  }
  0x23   :  { %2228 = dma.done.wait [#allocation3], 512  }
  0x24   :  { %2229 = vsyncadd [#allocation3], 4294966784 }
  0x25   :  { %2230 = dma.done.wait [#allocation6], 20480  }
  0x26   :  { %2231 = vsyncadd [#allocation6], 4294946816  ;;  %v2241_v0 = vmov 0   ;;  %v2242_v1 = vmov 2   ;;  %v70_v2 = vld [vmem:[%s2434_s0] sm:$0xff]  ;;  %v2243_v9 = vmov 1  }
  0x27   :  { %1918 = vset.pattern.permute.xlu0 %v2241_v0  ;;  %1920 = vset.pattern.permute.xlu1 %v2242_v1  ;;  %v1924_v3 = vld [vmem:[#allocation5 + $0xe4] ss:$16 sps:$4 sm:$0xff]   ;;  %v1928_v5 = vld [vmem:[#allocation5 + $0xe0] ss:$16 sps:$4 sm:$0xff]   ;;  %v2244_v10 = vmov 3   ;;  %v2245_v17 = vmov 4  }
  0x28   :  { %77 = vperm.xlu0 %1918, %v70_v2   ;;  %129 = vperm.xlu1 %1920, %v70_v2   ;;  %v1926_v4 = vld [vmem:[#allocation5 + $0x2e4] ss:$16 sps:$4 sm:$0xff]   ;;  %v1929_v6 = vld [vmem:[#allocation5 + $0x2e0] ss:$16 sps:$4 sm:$0xff]   ;;  %v2246_v18 = vmov 5   ;;  %vm1651_vm0 = vcmask 7168  }
  0x29   :  { %1074 = vmatprep.subr.bf16.mxu0 %v1924_v3  ;;  %v1930_v7 = vld [vmem:[#allocation5 + $0xc4] ss:$16 sps:$4 sm:$0xff]   ;;  %1115 = vmatprep.subr.bf16.mxu1 %v1926_v4  ;;  %v1934_v11 = vld [vmem:[#allocation5 + $0xc0] ss:$16 sps:$4 sm:$0xff]  }
  0x2a   :  { %1075 = vmatpush1.bf16.msra.mxu0 %v1928_v5  ;;  %v1932_v8 = vld [vmem:[#allocation5 + $0x2c4] ss:$16 sps:$4 sm:$0xff]   ;;  %1116 = vmatpush1.bf16.msra.mxu1 %v1929_v6  ;;  %v1935_v13 = vld [vmem:[#allocation5 + $0x2c0] ss:$16 sps:$4 sm:$0xff]  }
  0x2b   :  { %v1936_v12 = vld [vmem:[#allocation5 + $0xa4] ss:$16 sps:$4 sm:$0xff]   ;;  %1076 = vmatprep.subr.bf16.mxu0 %v1930_v7  ;;  %1117 = vmatprep.subr.bf16.mxu1 %v1932_v8  ;;  %v1940_v15 = vld [vmem:[#allocation5 + $0xa0] ss:$16 sps:$4 sm:$0xff]   ;;  %v2022_v7 = vld [vmem:[#allocation5 + $0xec] ss:$16 sps:$4 sm:$0xff]  }
  0x2c   :  { %1919 = vset.pattern.permute.xlu0 %v2243_v9  ;;  %1921 = vset.pattern.permute.xlu1 %v2244_v10  ;;  %v1938_v14 = vld [vmem:[#allocation5 + $0x2a4] ss:$16 sps:$4 sm:$0xff]   ;;  %v1941_v19 = vld [vmem:[#allocation5 + $0x2a0] ss:$16 sps:$4 sm:$0xff]   ;;  %v2025_v9 = vld [vmem:[#allocation5 + $0x2ec] ss:$16 sps:$4 sm:$0xff]  }
  0x2d   :  { %101 = vperm.xlu0 %1919, %v70_v2   ;;  %157 = vperm.xlu1 %1921, %v70_v2   ;;  %v1942_v16 = vld [vmem:[#allocation5 + $0x84] ss:$16 sps:$4 sm:$0xff]   ;;  %v1946_v20 = vld [vmem:[#allocation5 + $0x80] ss:$16 sps:$4 sm:$0xff]   ;;  %v2247_v10 = vmov 1966171168  }
  0x2e   :  { %1077 = vmatpush1.bf16.msra.mxu0 %v1934_v11  ;;  %1118 = vmatpush1.bf16.msra.mxu1 %v1935_v13  ;;  %v1944_v21 = vld [vmem:[#allocation5 + $0x284] ss:$16 sps:$4 sm:$0xff]   ;;  %v1947_v23 = vld [vmem:[#allocation5 + $0x280] ss:$16 sps:$4 sm:$0xff]   ;;  %v255_v11 = vunpack.c.l.s4 %v2247_v10 }
  0x2f   :  { %1078 = vmatprep.subr.bf16.mxu0 %v1936_v12  ;;  %1119 = vmatprep.subr.bf16.mxu1 %v1938_v14  ;;  %v1948_v22 = vld [vmem:[#allocation5 + $0x64] ss:$16 sps:$4 sm:$0xff]   ;;  %v1952_v25 = vld [vmem:[#allocation5 + $0x60] ss:$16 sps:$4 sm:$0xff]   ;;  %v80_v12 = vlaneseq }
  0x30   :  { %v1950_v24 = vld [vmem:[#allocation5 + $0x264] ss:$16 sps:$4 sm:$0xff]   ;;  %v1953_v27 = vld [vmem:[#allocation5 + $0x260] ss:$16 sps:$4 sm:$0xff]   ;;  %v256_v13 = vunpack.c.0.s8 %v255_v11 }
  0x31   :  { %1922 = vset.pattern.permute.xlu1 %v2245_v17  ;;  %1923 = vset.pattern.permute.xlu0 %v2246_v18  ;;  %v1954_v26 = vld [vmem:[#allocation5 + $0x44] ss:$16 sps:$4 sm:$0xff]   ;;  %v1958_v28 = vld [vmem:[#allocation5 + $0x40] ss:$16 sps:$4 sm:$0xff]   ;;  %v81_v14 = vshrl.u32 %v80_v12, 7 }
  0x32   :  { %185 = vperm.xlu1 %1922, %v70_v2   ;;  %213 = vperm.xlu0 %1923, %v70_v2   ;;  %v1956_v29 = vld [vmem:[#allocation5 + $0x244] ss:$16 sps:$4 sm:$0xff]   ;;  %v1959_v31 = vld [vmem:[#allocation5 + $0x240] ss:$16 sps:$4 sm:$0xff]  }
  0x33   :  { %1079 = vmatpush1.bf16.msra.mxu0 %v1940_v15  ;;  %1120 = vmatpush1.bf16.msra.mxu1 %v1941_v19  ;;  %v1960_v30 = vld [vmem:[#allocation5 + $0x24] ss:$16 sps:$4 sm:$0xff]   ;;  %v1964_v33 = vld [vmem:[#allocation5 + $0x20] ss:$16 sps:$4 sm:$0xff]   ;;  %v2316_v17 = vsub.s32 %v256_v13, %v81_v14  ;;  %v2318_v18 = vsub.s32 0, %v81_v14 }
  0x34   :  { %1080 = vmatprep.subr.bf16.mxu0 %v1942_v16  ;;  %1121 = vmatprep.subr.bf16.mxu1 %v1944_v21  ;;  %v1962_v32 = vld [vmem:[#allocation5 + $0x224] ss:$16 sps:$4 sm:$0xff]   ;;  %v1965_v35 = vld [vmem:[#allocation5 + $0x220] ss:$16 sps:$4 sm:$0xff]   ;;  %v134_v21 = vsub.s32 2, %v81_v14 }
  0x35   :  { %v1966_v34 = vld [vmem:[#allocation5 + $0x4] ss:$16 sps:$4 sm:$0xff]   ;;  %v1970_v36 = vld [vmem:[#allocation5] ss:$16 sps:$4 sm:$0xff]  }
  0x36   :  { %v1968_v37 = vld [vmem:[#allocation5 + $0x204] ss:$16 sps:$4 sm:$0xff]   ;;  %v1971_v39 = vld [vmem:[#allocation5 + $0x200] ss:$16 sps:$4 sm:$0xff]  }
  0x37   :  { %1081 = vmatpush1.bf16.msra.mxu0 %v1946_v20  ;;  %1122 = vmatpush1.bf16.msra.mxu1 %v1947_v23  ;;  %v1972_v38 = vld [vmem:[#allocation5 + $0x1e4] ss:$16 sps:$4 sm:$0xff]   ;;  %v1976_v40 = vld [vmem:[#allocation5 + $0x1e0] ss:$16 sps:$4 sm:$0xff]   ;;  %v2322_v20 = vld [vmem:[#allocation2 + $0x8] sm:$0x3f] }
  0x38   :  { %1082 = vmatprep.subr.bf16.mxu0 %v1948_v22  ;;  %1123 = vmatprep.subr.bf16.mxu1 %v1950_v24  ;;  %v1974_v41 = vld [vmem:[#allocation5 + $0x3e4] ss:$16 sps:$4 sm:$0xff]   ;;  %v1977_v43 = vld [vmem:[#allocation5 + $0x3e0] ss:$16 sps:$4 sm:$0xff]   ;;  %v2326_v23 = vld [vmem:[#allocation2 + $0x18] sm:$0x3f] }
  0x39   :  { %v1978_v42 = vld [vmem:[#allocation5 + $0x1c4] ss:$16 sps:$4 sm:$0xff]   ;;  %v1982_v45 = vld [vmem:[#allocation5 + $0x1c0] ss:$16 sps:$4 sm:$0xff]   ;;  %v106_v24 = vsub.s32 1, %v81_v14 }
  0x3a   :  { %v1980_v44 = vld [vmem:[#allocation5 + $0x3c4] ss:$16 sps:$4 sm:$0xff]   ;;  %v1983_v47 = vld [vmem:[#allocation5 + $0x3c0] ss:$16 sps:$4 sm:$0xff]  }
  0x3b   :  { %1083 = vmatpush1.bf16.msra.mxu0 %v1952_v25  ;;  %1124 = vmatpush1.bf16.msra.mxu1 %v1953_v27  ;;  %v1984_v46 = vld [vmem:[#allocation5 + $0x1a4] ss:$16 sps:$4 sm:$0xff]   ;;  %v1988_v48 = vld [vmem:[#allocation5 + $0x1a0] ss:$16 sps:$4 sm:$0xff]   ;;  %v162_v25 = vsub.s32 3, %v81_v14 }
  0x3c   :  { %1084 = vmatprep.subr.bf16.mxu0 %v1954_v26  ;;  %1125 = vmatprep.subr.bf16.mxu1 %v1956_v29  ;;  %v1986_v49 = vld [vmem:[#allocation5 + $0x3a4] ss:$16 sps:$4 sm:$0xff]   ;;  %v1989_v51 = vld [vmem:[#allocation5 + $0x3a0] ss:$16 sps:$4 sm:$0xff]   ;;  %v87_v29 = vrot.slane %v2322_v20, %v2318_v18 }
  0x3d   :  { %v1990_v50 = vld [vmem:[#allocation5 + $0x184] ss:$16 sps:$4 sm:$0xff]   ;;  %v1994_v53 = vld [vmem:[#allocation5 + $0x180] ss:$16 sps:$4 sm:$0xff]  }
  0x3e   :  { %v1992_v52 = vld [vmem:[#allocation5 + $0x384] ss:$16 sps:$4 sm:$0xff]   ;;  %v1995_v55 = vld [vmem:[#allocation5 + $0x380] ss:$16 sps:$4 sm:$0xff]  }
  0x3f   :  { %1085 = vmatpush1.bf16.msra.mxu0 %v1958_v28  ;;  %1126 = vmatpush1.bf16.msra.mxu1 %v1959_v31  ;;  %v1996_v54 = vld [vmem:[#allocation5 + $0x164] ss:$16 sps:$4 sm:$0xff]   ;;  %v2000_v57 = vld [vmem:[#allocation5 + $0x160] ss:$16 sps:$4 sm:$0xff]   ;;  %v2340_v31 = vsub.s32 5, %v81_v14 }
  0x40   :  { %1086 = vmatprep.subr.bf16.mxu0 %v1960_v30  ;;  %1127 = vmatprep.subr.bf16.mxu1 %v1962_v32  ;;  %v1998_v56 = vld [vmem:[#allocation5 + $0x364] ss:$16 sps:$4 sm:$0xff]   ;;  %v2001_v59 = vld [vmem:[#allocation5 + $0x360] ss:$16 sps:$4 sm:$0xff]   ;;  %v2338_v30 = vsub.s32 4, %v81_v14 }
  0x41   :  { %v2002_v58 = vld [vmem:[#allocation5 + $0x144] ss:$16 sps:$4 sm:$0xff]   ;;  %v2006_v61 = vld [vmem:[#allocation5 + $0x140] ss:$16 sps:$4 sm:$0xff]  }
  0x42   :  { %v2004_v60 = vld [vmem:[#allocation5 + $0x344] ss:$16 sps:$4 sm:$0xff]   ;;  %v2007_v63 = vld [vmem:[#allocation5 + $0x340] ss:$16 sps:$4 sm:$0xff]  }
  0x43   :  { %1087 = vmatpush1.bf16.msra.mxu0 %v1964_v33  ;;  %1128 = vmatpush1.bf16.msra.mxu1 %v1965_v35  ;;  %v2008_v62 = vld [vmem:[#allocation5 + $0x124] ss:$16 sps:$4 sm:$0xff]   ;;  %v2012_v2 = vld [vmem:[#allocation5 + $0x120] ss:$16 sps:$4 sm:$0xff]   ;;  %v95_v33 = vrot.slane %v2326_v23, %v2318_v18  ;;  %v139_v35 = vrot.slane %v2322_v20, %v134_v21 }
  0x44   :  { %1088 = vmatprep.subr.bf16.mxu0 %v1966_v34  ;;  %1129 = vmatprep.subr.bf16.mxu1 %v1968_v37  ;;  %v2010_v1 = vld [vmem:[#allocation5 + $0x324] ss:$16 sps:$4 sm:$0xff]   ;;  %v2013_v4 = vld [vmem:[#allocation5 + $0x320] ss:$16 sps:$4 sm:$0xff]   ;;  %v147_v37 = vrot.slane %v2326_v23, %v134_v21 }
  0x45   :  { %v2014_v3 = vld [vmem:[#allocation5 + $0x104] ss:$16 sps:$4 sm:$0xff]   ;;  %v2018_v6 = vld [vmem:[#allocation5 + $0x100] ss:$16 sps:$4 sm:$0xff]  }
  0x46   :  { %v2016_v5 = vld [vmem:[#allocation5 + $0x304] ss:$16 sps:$4 sm:$0xff]   ;;  %v2019_v8 = vld [vmem:[#allocation5 + $0x300] ss:$16 sps:$4 sm:$0xff]  }
  0x47   :  { %1089 = vmatpush1.bf16.msra.mxu0 %v1970_v36  ;;  %1130 = vmatpush1.bf16.msra.mxu1 %v1971_v39  ;;  %v1696_v15 = vld.sshfl [vmem:[%s2436_s2] sm:$0x33 pattern:$0x75316420]  ;;  %v2324_v22 = vld [vmem:[#allocation2 + $0x10] sm:$0x3f]  ;;  %v111_v39 = vrot.slane %v2322_v20, %v106_v24 }
  0x48   :  { %1090 = vmatprep.subr.bf16.mxu0 %v1972_v38  ;;  %1131 = vmatprep.subr.bf16.mxu1 %v1974_v41  ;;  %v253_v16 = vcombine.high %v1696_v15, %v1696_v15  ;;  %v2320_v19 = vld [vmem:[#allocation2] sm:$0x3f]  ;;  %v2332_v27 = vrot.slane %v1696_v15, %v2316_v17  ;;  %v91_v32 = vrot.slane %v2324_v22, %v2318_v18 }
  0x49   :  { %v83_v28 = vrot.slane %v2320_v19, %v2318_v18  ;;  %v135_v34 = vrot.slane %v2320_v19, %v134_v21  ;;  %v143_v36 = vrot.slane %v2324_v22, %v134_v21  ;;  %v107_v38 = vrot.slane %v2320_v19, %v106_v24 }
  0x4a   :  { %v2329_v26 = vrot.slane %v253_v16, %v2316_v17 }
  0x4b   :  { %1091 = vmatpush2.bf16.msra.mxu0 %v1976_v40  ;;  %1132 = vmatpush2.bf16.msra.mxu1 %v1977_v43  ;;  %v119_v43 = vrot.slane %v2326_v23, %v106_v24 }
  0x4c   :  { %1092 = vmatprep.subr.bf16.mxu0 %v1978_v42  ;;  %1133 = vmatprep.subr.bf16.mxu1 %v1980_v44  ;;  %v115_v42 = vrot.slane %v2324_v22, %v106_v24  ;;  %v2356_v44 = vcombine.high %v2329_v26, %v2329_v26 }
  0x4f   :  { %1093 = vmatpush2.bf16.msra.mxu0 %v1982_v45  ;;  %1134 = vmatpush2.bf16.msra.mxu1 %v1983_v47  ;;  %v2360_v45 = vcombine.high %v2332_v27, %v2332_v27  ;;  %v167_v47 = vrot.slane %v2322_v20, %v162_v25 }
  0x50   :  { %1094 = vmatprep.subr.bf16.mxu0 %v1984_v46  ;;  %1135 = vmatprep.subr.bf16.mxu1 %v1986_v49  ;;  %v163_v46 = vrot.slane %v2320_v19, %v162_v25  ;;  %v175_v49 = vrot.slane %v2326_v23, %v162_v25 }
  0x53   :  { %1095 = vmatpush2.bf16.msra.mxu0 %v1988_v48  ;;  %1136 = vmatpush2.bf16.msra.mxu1 %v1989_v51  ;;  %v171_v48 = vrot.slane %v2324_v22, %v162_v25  ;;  %v195_v51 = vrot.slane %v2322_v20, %v2338_v30 }
  0x54   :  { %1096 = vmatprep.subr.bf16.mxu0 %v1990_v50  ;;  %1137 = vmatprep.subr.bf16.mxu1 %v1992_v52  ;;  %v191_v50 = vrot.slane %v2320_v19, %v2338_v30  ;;  %v199_v52 = vrot.slane %v2324_v22, %v2338_v30 }
  0x57   :  { %1097 = vmatpush2.bf16.msra.mxu0 %v1994_v53  ;;  %1138 = vmatpush2.bf16.msra.mxu1 %v1995_v55  ;;  %v203_v53 = vrot.slane %v2326_v23, %v2338_v30  ;;  %v223_v55 = vrot.slane %v2322_v20, %v2340_v31 }
  0x58   :  { %1098 = vmatprep.subr.bf16.mxu0 %v1996_v54  ;;  %1139 = vmatprep.subr.bf16.mxu1 %v1998_v56  ;;  %v219_v54 = vrot.slane %v2320_v19, %v2340_v31  ;;  %v227_v56 = vrot.slane %v2324_v22, %v2340_v31 }
  0x5b   :  { %1099 = vmatpush2.bf16.msra.mxu0 %v2000_v57  ;;  %1140 = vmatpush2.bf16.msra.mxu1 %v2001_v59  ;;  %v231_v57 = vrot.slane %v2326_v23, %v2340_v31  ;;  %v292_v59 = vpack.i.b16 %v2356_v44, %v2356_v44 }
  0x5c   :  { %1100 = vmatprep.subr.bf16.mxu0 %v2002_v58  ;;  %1141 = vmatprep.subr.bf16.mxu1 %v2004_v60  ;;  %v278_v58 = vpack.i.b16 %v2329_v26, %v2329_v26  ;;  %v271_v60 = vpack.i.b16 %v2332_v27, %v2332_v27 }
  0x5f   :  { %1101 = vmatpush2.bf16.msra.mxu0 %v2006_v61  ;;  %1142 = vmatpush2.bf16.msra.mxu1 %v2007_v63  ;;  %v285_v61 = vpack.i.b16 %v2360_v45, %v2360_v45 }
  0x60   :  { %1102 = vmatprep.subr.bf16.mxu0 %v2008_v62  ;;  %1143 = vmatprep.subr.bf16.mxu1 %v2010_v1 }
  0x63   :  { %1103 = vmatpush2.bf16.msra.mxu0 %v2012_v2  ;;  %1144 = vmatpush2.bf16.msra.mxu1 %v2013_v4 }
  0x64   :  { %1104 = vmatprep.subr.bf16.mxu0 %v2014_v3  ;;  %1145 = vmatprep.subr.bf16.mxu1 %v2016_v5 }
  0x67   :  { %1105 = vmatpush2.bf16.msra.mxu0 %v2018_v6  ;;  %1146 = vmatpush2.bf16.msra.mxu1 %v2019_v8 }
  0x68   :  { %1156 = vmatprep.subr.bf16.mxu0 %v2022_v7  ;;  %1197 = vmatprep.subr.bf16.mxu1 %v2025_v9 }
  0xa3   :  { %v78_v40 = vpop.permute.xlu0 %77  ;;  %v130_v41 = vpop.permute.xlu1 %129 }
  0xa4   :  { %v96_v62 = vmul.f32 %v83_v28, %v78_v40  ;;  %v97_v63 = vmul.f32 %v87_v29, %v78_v40  ;;  %v98_v1 = vmul.f32 %v91_v32, %v78_v40  ;;  %v99_v2 = vmul.f32 %v95_v33, %v78_v40 }
  0xa5   :  { %v148_v9 = vmul.f32 %v135_v34, %v130_v41  ;;  %v149_v10 = vmul.f32 %v139_v35, %v130_v41  ;;  %v150_v11 = vmul.f32 %v143_v36, %v130_v41  ;;  %v151_v13 = vmul.f32 %v147_v37, %v130_v41 }
  0xa8   :  { %v102_v3 = vpop.permute.xlu0 %101  ;;  %v158_v4 = vpop.permute.xlu1 %157 }
  0xa9   :  { %v120_v5 = vmul.f32 %v107_v38, %v102_v3  ;;  %v121_v6 = vmul.f32 %v111_v39, %v102_v3  ;;  %v122_v7 = vmul.f32 %v115_v42, %v102_v3  ;;  %v123_v8 = vmul.f32 %v119_v43, %v102_v3  ;;  %v2020_v3 = vld [vmem:[#allocation5 + $0xe8] ss:$16 sps:$4 sm:$0xff]  }
  0xaa   :  { %v176_v20 = vmul.f32 %v163_v46, %v158_v4  ;;  %v177_v21 = vmul.f32 %v167_v47, %v158_v4  ;;  %v178_v22 = vmul.f32 %v171_v48, %v158_v4  ;;  %v179_v23 = vmul.f32 %v175_v49, %v158_v4 }
  0xab   :  { %v124_v14 = vadd.f32 %v120_v5, %v96_v62  ;;  %v125_v15 = vadd.f32 %v121_v6, %v97_v63  ;;  %v126_v16 = vadd.f32 %v122_v7, %v98_v1  ;;  %v127_v19 = vadd.f32 %v123_v8, %v99_v2  ;;  %v2028_v5 = vld [vmem:[#allocation5 + $0xcc] ss:$16 sps:$4 sm:$0xff]   ;;  %v2026_v7 = vld [vmem:[#allocation5 + $0xc8] ss:$16 sps:$4 sm:$0xff]  }
  0xac   :  { %v283_v46 = vrot.slane %v278_v58, %v2318_v18  ;;  %v297_v47 = vrot.slane %v292_v59, %v2318_v18  ;;  %v276_v48 = vrot.slane %v271_v60, %v2318_v18  ;;  %v290_v49 = vrot.slane %v285_v61, %v2318_v18  ;;  %v2023_v60 = vld [vmem:[#allocation5 + $0x2e8] ss:$16 sps:$4 sm:$0xff]   ;;  %v2031_v6 = vld [vmem:[#allocation5 + $0x2cc] ss:$16 sps:$4 sm:$0xff]  }
  0xad   :  { %v152_v24 = vadd.f32 %v148_v9, %v124_v14  ;;  %v153_v25 = vadd.f32 %v149_v10, %v125_v15  ;;  %v154_v26 = vadd.f32 %v150_v11, %v126_v16  ;;  %v155_v27 = vadd.f32 %v151_v13, %v127_v19  ;;  %v186_v28 = vpop.permute.xlu1 %185  ;;  %v214_v29 = vpop.permute.xlu0 %213  ;;  %v2029_v8 = vld [vmem:[#allocation5 + $0x2c8] ss:$16 sps:$4 sm:$0xff]   ;;  %v2034_v9 = vld [vmem:[#allocation5 + $0xac] ss:$16 sps:$4 sm:$0xff]  }
  0xae   :  { %v204_v30 = vmul.f32 %v191_v50, %v186_v28  ;;  %v205_v31 = vmul.f32 %v195_v51, %v186_v28  ;;  %v206_v32 = vmul.f32 %v199_v52, %v186_v28  ;;  %v207_v33 = vmul.f32 %v203_v53, %v186_v28  ;;  %v2037_v10 = vld [vmem:[#allocation5 + $0x2ac] ss:$16 sps:$4 sm:$0xff]   ;;  %v2032_v11 = vld [vmem:[#allocation5 + $0xa8] ss:$16 sps:$4 sm:$0xff]  }
  0xaf   :  { %v180_v34 = vadd.f32 %v176_v20, %v152_v24  ;;  %v181_v35 = vadd.f32 %v177_v21, %v153_v25  ;;  %v182_v36 = vadd.f32 %v178_v22, %v154_v26  ;;  %v183_v37 = vadd.f32 %v179_v23, %v155_v27  ;;  %v2035_v13 = vld [vmem:[#allocation5 + $0x2a8] ss:$16 sps:$4 sm:$0xff]   ;;  %v2040_v14 = vld [vmem:[#allocation5 + $0x8c] ss:$16 sps:$4 sm:$0xff]  }
  0xb0   :  { %v232_v38 = vmul.f32 %v219_v54, %v214_v29  ;;  %v233_v39 = vmul.f32 %v223_v55, %v214_v29  ;;  %v234_v40 = vmul.f32 %v227_v56, %v214_v29  ;;  %v235_v41 = vmul.f32 %v231_v57, %v214_v29  ;;  %v2043_v15 = vld [vmem:[#allocation5 + $0x28c] ss:$16 sps:$4 sm:$0xff]   ;;  %v2038_v16 = vld [vmem:[#allocation5 + $0x88] ss:$16 sps:$4 sm:$0xff]  }
  0xb1   :  { %v208_v42 = vadd.f32 %v204_v30, %v180_v34  ;;  %v209_v43 = vadd.f32 %v205_v31, %v181_v35  ;;  %v210_v44 = vadd.f32 %v206_v32, %v182_v36  ;;  %v211_v45 = vadd.f32 %v207_v33, %v183_v37  ;;  %v2041_v19 = vld [vmem:[#allocation5 + $0x288] ss:$16 sps:$4 sm:$0xff]   ;;  %v2046_v20 = vld [vmem:[#allocation5 + $0x6c] ss:$16 sps:$4 sm:$0xff]  }
  0xb2   :  { %v2049_v21 = vld [vmem:[#allocation5 + $0x26c] ss:$16 sps:$4 sm:$0xff]   ;;  %v2044_v22 = vld [vmem:[#allocation5 + $0x68] ss:$16 sps:$4 sm:$0xff]  }
  0xb3   :  { %v236_v50 = vadd.f32 %v232_v38, %v208_v42  ;;  %v238_v51 = vadd.f32 %v234_v40, %v210_v44  ;;  %v237_v52 = vadd.f32 %v233_v39, %v209_v43  ;;  %v239_v53 = vadd.f32 %v235_v41, %v211_v45  ;;  %v2047_v23 = vld [vmem:[#allocation5 + $0x268] ss:$16 sps:$4 sm:$0xff]   ;;  %v2052_v24 = vld [vmem:[#allocation5 + $0x4c] ss:$16 sps:$4 sm:$0xff]  }
  0xb4   :  { %v2055_v25 = vld [vmem:[#allocation5 + $0x24c] ss:$16 sps:$4 sm:$0xff]   ;;  %v2050_v26 = vld [vmem:[#allocation5 + $0x48] ss:$16 sps:$4 sm:$0xff]  }
  0xb5   :  { %v241_v54 = vpack.c.bf16 %v237_v52, %v237_v52  ;;  %v243_v55 = vpack.c.bf16 %v239_v53, %v239_v53  ;;  %v240_v56 = vpack.c.bf16 %v236_v50, %v236_v50  ;;  %v242_v57 = vpack.c.bf16 %v238_v51, %v238_v51  ;;  %v2053_v27 = vld [vmem:[#allocation5 + $0x248] ss:$16 sps:$4 sm:$0xff]   ;;  %v2058_v28 = vld [vmem:[#allocation5 + $0x2c] ss:$16 sps:$4 sm:$0xff]  }
  0xb6   :  { %v2061_v29 = vld [vmem:[#allocation5 + $0x22c] ss:$16 sps:$4 sm:$0xff]   ;;  %v2056_v30 = vld [vmem:[#allocation5 + $0x28] ss:$16 sps:$4 sm:$0xff]  }
  0xb7   :  { %v299_v62 = vadd.bf16 %v283_v46, %v241_v54  ;;  %v301_v63 = vadd.bf16 %v297_v47, %v243_v55  ;;  %v298_v1 = vadd.bf16 %v276_v48, %v240_v56  ;;  %v300_v2 = vadd.bf16 %v290_v49, %v242_v57  ;;  %v2059_v31 = vld [vmem:[#allocation5 + $0x228] ss:$16 sps:$4 sm:$0xff]   ;;  %v2064_v32 = vld [vmem:[#allocation5 + $0xc] ss:$16 sps:$4 sm:$0xff]  }
  0xb8   :  { %v2067_v33 = vld [vmem:[#allocation5 + $0x20c] ss:$16 sps:$4 sm:$0xff]   ;;  %v2062_v34 = vld [vmem:[#allocation5 + $0x8] ss:$16 sps:$4 sm:$0xff]  }
  0xb9   :  { %v303_v58 = vmax.bf16 %v2241_v0, %v299_v62  ;;  %v305_v59 = vmax.bf16 %v2241_v0, %v301_v63  ;;  %v2397_v61 = vmax.bf16 %v2241_v0, %v298_v1  ;;  %v2400_v4 = vmax.bf16 %v2241_v0, %v300_v2  ;;  %v2065_v35 = vld [vmem:[#allocation5 + $0x208] ss:$16 sps:$4 sm:$0xff]   ;;  %v2070_v36 = vld [vmem:[#allocation5 + $0x1ec] ss:$16 sps:$4 sm:$0xff]  }
  0xba   :  { %v2073_v37 = vld [vmem:[#allocation5 + $0x3ec] ss:$16 sps:$4 sm:$0xff]   ;;  %v2068_v38 = vld [vmem:[#allocation5 + $0x1e8] ss:$16 sps:$4 sm:$0xff]  }
  0xbb   :  { %1106 = vmatprep.mubr.bf16.mxu0 %v303_v58  ;;  %1147 = vmatprep.mubr.bf16.mxu1 %v305_v59  ;;  %v2071_v39 = vld [vmem:[#allocation5 + $0x3e8] ss:$16 sps:$4 sm:$0xff]   ;;  %v2076_v40 = vld [vmem:[#allocation5 + $0x1cc] ss:$16 sps:$4 sm:$0xff]  }
  0xbc   :  { %1107 = vmatmul.mubr.bf16.vlgmr.msra.gmra.mxu0 %v2397_v61  ;;  %1148 = vmatmul.mubr.bf16.vlgmr.msra.gmra.mxu1 %v2400_v4  ;;  %v2079_v41 = vld [vmem:[#allocation5 + $0x3cc] ss:$16 sps:$4 sm:$0xff]   ;;  %v2074_v42 = vld [vmem:[#allocation5 + $0x1c8] ss:$16 sps:$4 sm:$0xff]  }
  0xbd   :  { %1157 = vmatpush1.bf16.msra.mxu0 %v2020_v3  ;;  %1198 = vmatpush1.bf16.msra.mxu1 %v2023_v60  ;;  %v2077_v43 = vld [vmem:[#allocation5 + $0x3c8] ss:$16 sps:$4 sm:$0xff]   ;;  %v2082_v44 = vld [vmem:[#allocation5 + $0x1ac] ss:$16 sps:$4 sm:$0xff]  }
  0xbe   :  { %1188 = vmatprep.mubr.bf16.mxu0 %v303_v58  ;;  %1229 = vmatprep.mubr.bf16.mxu1 %v305_v59  ;;  %v2085_v45 = vld [vmem:[#allocation5 + $0x3ac] ss:$16 sps:$4 sm:$0xff]   ;;  %v2080_v46 = vld [vmem:[#allocation5 + $0x1a8] ss:$16 sps:$4 sm:$0xff]  }
  0xbf   :  { %1158 = vmatprep.subr.bf16.mxu0 %v2028_v5  ;;  %1199 = vmatprep.subr.bf16.mxu1 %v2031_v6  ;;  %v2083_v47 = vld [vmem:[#allocation5 + $0x3a8] ss:$16 sps:$4 sm:$0xff]   ;;  %v2088_v48 = vld [vmem:[#allocation5 + $0x18c] ss:$16 sps:$4 sm:$0xff]  }
  0xc0   :  { %v2091_v49 = vld [vmem:[#allocation5 + $0x38c] ss:$16 sps:$4 sm:$0xff]   ;;  %v2086_v50 = vld [vmem:[#allocation5 + $0x188] ss:$16 sps:$4 sm:$0xff]  }
  0xc1   :  { %1159 = vmatpush1.bf16.msra.mxu0 %v2026_v7  ;;  %1200 = vmatpush1.bf16.msra.mxu1 %v2029_v8  ;;  %v2089_v51 = vld [vmem:[#allocation5 + $0x388] ss:$16 sps:$4 sm:$0xff]   ;;  %v2094_v52 = vld [vmem:[#allocation5 + $0x16c] ss:$16 sps:$4 sm:$0xff]  }
  0xc2   :  { %1160 = vmatprep.subr.bf16.mxu0 %v2034_v9  ;;  %1201 = vmatprep.subr.bf16.mxu1 %v2037_v10  ;;  %v2097_v53 = vld [vmem:[#allocation5 + $0x36c] ss:$16 sps:$4 sm:$0xff]   ;;  %v2092_v54 = vld [vmem:[#allocation5 + $0x168] ss:$16 sps:$4 sm:$0xff]   ;;  %v2118_v9 = vld [vmem:[#allocation7 + $0x70] sm:$0xff]  }
  0xc3   :  { %v2095_v55 = vld [vmem:[#allocation5 + $0x368] ss:$16 sps:$4 sm:$0xff]   ;;  %v2100_v56 = vld [vmem:[#allocation5 + $0x14c] ss:$16 sps:$4 sm:$0xff]   ;;  %v2119_v10 = vld [vmem:[#allocation7 + $0x30] sm:$0xff]  }
  0xc4   :  { %v2103_v57 = vld [vmem:[#allocation5 + $0x34c] ss:$16 sps:$4 sm:$0xff]   ;;  %v2098_v62 = vld [vmem:[#allocation5 + $0x148] ss:$16 sps:$4 sm:$0xff]  }
  0xc5   :  { %1161 = vmatpush1.bf16.msra.mxu0 %v2032_v11  ;;  %1202 = vmatpush1.bf16.msra.mxu1 %v2035_v13  ;;  %v2101_v63 = vld [vmem:[#allocation5 + $0x348] ss:$16 sps:$4 sm:$0xff]   ;;  %v2106_v1 = vld [vmem:[#allocation5 + $0x12c] ss:$16 sps:$4 sm:$0xff]  }
  0xc6   :  { %1162 = vmatprep.subr.bf16.mxu0 %v2040_v14  ;;  %1203 = vmatprep.subr.bf16.mxu1 %v2043_v15  ;;  %v2109_v2 = vld [vmem:[#allocation5 + $0x32c] ss:$16 sps:$4 sm:$0xff]   ;;  %v2104_v58 = vld [vmem:[#allocation5 + $0x128] ss:$16 sps:$4 sm:$0xff]   ;;  %v2122_v14 = vld [vmem:[#allocation7 + $0x60] sm:$0xff]  }
  0xc7   :  { %v2107_v59 = vld [vmem:[#allocation5 + $0x328] ss:$16 sps:$4 sm:$0xff]   ;;  %v2112_v3 = vld [vmem:[#allocation5 + $0x10c] ss:$16 sps:$4 sm:$0xff]   ;;  %v2123_v15 = vld [vmem:[#allocation7 + $0x20] sm:$0xff]  }
  0xc8   :  { %v2115_v60 = vld [vmem:[#allocation5 + $0x30c] ss:$16 sps:$4 sm:$0xff]   ;;  %v2110_v5 = vld [vmem:[#allocation5 + $0x108] ss:$16 sps:$4 sm:$0xff]  }
  0xc9   :  { %1163 = vmatpush1.bf16.msra.mxu0 %v2038_v16  ;;  %1204 = vmatpush1.bf16.msra.mxu1 %v2041_v19  ;;  %v2113_v6 = vld [vmem:[#allocation5 + $0x308] ss:$16 sps:$4 sm:$0xff]  }
  0xca   :  { %1164 = vmatprep.subr.bf16.mxu0 %v2046_v20  ;;  %1205 = vmatprep.subr.bf16.mxu1 %v2049_v21  ;;  %v2116_v7 = vld [vmem:[#allocation7 + $0x78] sm:$0xff]   ;;  %v2120_v11 = vld [vmem:[#allocation7 + $0x68] sm:$0xff]   ;;  %v2134_v21 = vld [vmem:[#allocation7 + $0xf0] sm:$0xff]  }
  0xcb   :  { %v2117_v8 = vld [vmem:[#allocation7 + $0x38] sm:$0xff]   ;;  %v2121_v13 = vld [vmem:[#allocation7 + $0x28] sm:$0xff]  }
  0xcc   :  { %v2124_v16 = vld [vmem:[#allocation7 + $0x58] sm:$0xff]  }
  0xcd   :  { %1165 = vmatpush1.bf16.msra.mxu0 %v2044_v22  ;;  %1206 = vmatpush1.bf16.msra.mxu1 %v2047_v23  ;;  %v2132_v19 = vld [vmem:[#allocation7 + $0xf8] sm:$0xff]   ;;  %v2136_v23 = vld [vmem:[#allocation7 + $0xe8] sm:$0xff]  }
  0xce   :  { %1166 = vmatprep.subr.bf16.mxu0 %v2052_v24  ;;  %1207 = vmatprep.subr.bf16.mxu1 %v2055_v25  ;;  %v2133_v20 = vld [vmem:[#allocation7 + $0xb8] sm:$0xff]   ;;  %v2127_v24 = vld [vmem:[#allocation7 + $0x10] sm:$0xff]   ;;  %v2128_v25 = vld [vmem:[#allocation7 + $0x48] sm:$0xff]  }
  0xcf   :  { %v2125_v22 = vld [vmem:[#allocation7 + $0x18] sm:$0xff]  }
  0xd1   :  { %1167 = vmatpush1.bf16.msra.mxu0 %v2050_v26  ;;  %1208 = vmatpush1.bf16.msra.mxu1 %v2053_v27  ;;  %v2137_v26 = vld [vmem:[#allocation7 + $0xa8] sm:$0xff]   ;;  %v2138_v27 = vld [vmem:[#allocation7 + $0xe0] sm:$0xff]  }
  0xd2   :  { %1168 = vmatprep.subr.bf16.mxu0 %v2058_v28  ;;  %1209 = vmatprep.subr.bf16.mxu1 %v2061_v29  ;;  %v2129_v28 = vld [vmem:[#allocation7 + $0x8] sm:$0xff]   ;;  %v2130_v29 = vld [vmem:[#allocation7 + $0x40] sm:$0xff]  }
  0xd5   :  { %1169 = vmatpush1.bf16.msra.mxu0 %v2056_v30  ;;  %1210 = vmatpush1.bf16.msra.mxu1 %v2059_v31  ;;  %v2139_v30 = vld [vmem:[#allocation7 + $0xa0] sm:$0xff]   ;;  %v2140_v31 = vld [vmem:[#allocation7 + $0xd8] sm:$0xff]  }
  0xd6   :  { %1170 = vmatprep.subr.bf16.mxu0 %v2064_v32  ;;  %1211 = vmatprep.subr.bf16.mxu1 %v2067_v33  ;;  %v2131_v32 = vld [vmem:[#allocation7] sm:$0xff]   ;;  %v2141_v33 = vld [vmem:[#allocation7 + $0x98] sm:$0xff]  }
  0xd9   :  { %1171 = vmatpush1.bf16.msra.mxu0 %v2062_v34  ;;  %1212 = vmatpush1.bf16.msra.mxu1 %v2065_v35  ;;  %v2142_v34 = vld [vmem:[#allocation7 + $0xd0] sm:$0xff]  }
  0xda   :  { %1172 = vmatprep.subr.bf16.mxu0 %v2070_v36  ;;  %1213 = vmatprep.subr.bf16.mxu1 %v2073_v37  ;;  %v2143_v35 = vld [vmem:[#allocation7 + $0x90] sm:$0xff]   ;;  %v2144_v36 = vld [vmem:[#allocation7 + $0xc8] sm:$0xff]  }
  0xdb   :  { %v2145_v37 = vld [vmem:[#allocation7 + $0x88] sm:$0xff]  }
  0xdd   :  { %1173 = vmatpush2.bf16.msra.mxu0 %v2068_v38  ;;  %1214 = vmatpush2.bf16.msra.mxu1 %v2071_v39  ;;  %v2146_v38 = vld [vmem:[#allocation7 + $0xc0] sm:$0xff]  }
  0xde   :  { %1174 = vmatprep.subr.bf16.mxu0 %v2076_v40  ;;  %1215 = vmatprep.subr.bf16.mxu1 %v2079_v41  ;;  %v2147_v39 = vld [vmem:[#allocation7 + $0x80] sm:$0xff]  }
  0xdf   :  { %v1825_v40 = vld.sshfl [vmem:[%s2438_s4] sm:$0x33 pattern:$0x75316420] }
  0xe0   :  { %v1251_v41 = vcombine.high %v1825_v40, %v1825_v40 }
  0xe1   :  { %1175 = vmatpush2.bf16.msra.mxu0 %v2074_v42  ;;  %1216 = vmatpush2.bf16.msra.mxu1 %v2077_v43  ;;  %v1258_v42 = vrot.slane %v1825_v40, %v2316_v17 }
  0xe2   :  { %1176 = vmatprep.subr.bf16.mxu0 %v2082_v44  ;;  %1217 = vmatprep.subr.bf16.mxu1 %v2085_v45  ;;  %v1265_v43 = vrot.slane %v1251_v41, %v2316_v17 }
  0xe3   :  { %v1269_v44 = vpack.i.b16 %v1258_v42, %v1258_v42 }
  0xe4   :  { %v1276_v45 = vpack.i.b16 %v1265_v43, %v1265_v43 }
  0xe5   :  { %1177 = vmatpush2.bf16.msra.mxu0 %v2080_v46  ;;  %1218 = vmatpush2.bf16.msra.mxu1 %v2083_v47 }
  0xe6   :  { %1178 = vmatprep.subr.bf16.mxu0 %v2088_v48  ;;  %1219 = vmatprep.subr.bf16.mxu1 %v2091_v49  ;;  %v1274_v49 = vrot.slane %v1269_v44, %v2318_v18 }
  0xe9   :  { %1179 = vmatpush2.bf16.msra.mxu0 %v2086_v50  ;;  %1220 = vmatpush2.bf16.msra.mxu1 %v2089_v51 }
  0xea   :  { %1180 = vmatprep.subr.bf16.mxu0 %v2094_v52  ;;  %1221 = vmatprep.subr.bf16.mxu1 %v2097_v53 }
  0xed   :  { %1181 = vmatpush2.bf16.msra.mxu0 %v2092_v54  ;;  %1222 = vmatpush2.bf16.msra.mxu1 %v2095_v55  ;;  %v1281_v54 = vrot.slane %v1276_v45, %v2318_v18 }
  0xee   :  { %1182 = vmatprep.subr.bf16.mxu0 %v2100_v56  ;;  %1223 = vmatprep.subr.bf16.mxu1 %v2103_v57 }
  0xf1   :  { %1183 = vmatpush2.bf16.msra.mxu0 %v2098_v62  ;;  %1224 = vmatpush2.bf16.msra.mxu1 %v2101_v63 }
  0xf2   :  { %1184 = vmatprep.subr.bf16.mxu0 %v2106_v1  ;;  %1225 = vmatprep.subr.bf16.mxu1 %v2109_v2 }
  0xf5   :  { %1185 = vmatpush2.bf16.msra.mxu0 %v2104_v58  ;;  %1226 = vmatpush2.bf16.msra.mxu1 %v2107_v59  ;;  %v1266_v59 = vcombine.high %v1258_v42, %v1258_v42 }
  0xf6   :  { %1186 = vmatprep.subr.bf16.mxu0 %v2112_v3  ;;  %1227 = vmatprep.subr.bf16.mxu1 %v2115_v60  ;;  %v1267_v3 = vcombine.high %v1265_v43, %v1265_v43 }
  0xf7   :  { %v1283_v60 = vpack.i.b16 %v1266_v59, %v1266_v59 }
  0xf9   :  { %1187 = vmatpush2.bf16.msra.mxu0 %v2110_v5  ;;  %1228 = vmatpush2.bf16.msra.mxu1 %v2113_v6  ;;  %v1290_v5 = vpack.i.b16 %v1267_v3, %v1267_v3 }
  0xfa   :  { %1859 = vmatprep.subr.bf16.mxu0 %v2116_v7  ;;  %1881 = vmatprep.subr.bf16.mxu1 %v2132_v19 }
  0xfc   :  { %1189 = vmatmul.mubr.bf16.vlgmr.msra.gmra.mxu0 %v2397_v61  ;;  %1230 = vmatmul.mubr.bf16.vlgmr.msra.gmra.mxu1 %v2400_v4  ;;  %v2126_v61 = vld [vmem:[#allocation7 + $0x50] sm:$0xff]  }
  0xfd   :  { %1860 = vmatpush3.bf16.msra.mxu0 %v2117_v8  ;;  %1882 = vmatpush3.bf16.msra.mxu1 %v2133_v20  ;;  %v2135_v4 = vld [vmem:[#allocation7 + $0xb0] sm:$0xff]  }
  0xfe   :  { %1861 = vmatprep.subr.bf16.mxu0 %v2118_v9  ;;  %1883 = vmatprep.subr.bf16.mxu1 %v2134_v21  ;;  %v1288_v9 = vrot.slane %v1283_v60, %v2318_v18 }
 0x101   :  { %1862 = vmatpush3.bf16.msra.mxu0 %v2119_v10  ;;  %1884 = vmatpush3.bf16.msra.mxu1 %v2135_v4 }
 0x102   :  { %1863 = vmatprep.subr.bf16.mxu0 %v2120_v11  ;;  %1885 = vmatprep.subr.bf16.mxu1 %v2136_v23 }
 0x105   :  { %1864 = vmatpush3.bf16.msra.mxu0 %v2121_v13  ;;  %1886 = vmatpush3.bf16.msra.mxu1 %v2137_v26 }
 0x106   :  { %1865 = vmatprep.subr.bf16.mxu0 %v2122_v14  ;;  %1887 = vmatprep.subr.bf16.mxu1 %v2138_v27 }
 0x109   :  { %1866 = vmatpush3.bf16.msra.mxu0 %v2123_v15  ;;  %1888 = vmatpush3.bf16.msra.mxu1 %v2139_v30  ;;  %v1295_v15 = vrot.slane %v1290_v5, %v2318_v18  ;;  %v1826_v18 = vld [vmem:[%s2440_s6] ss:$0 sm:$0xff]  ;;  %s2248_s6 = smov [#allocation8]  }
 0x10a   :  { %1867 = vmatprep.subr.bf16.mxu0 %v2124_v16  ;;  %1889 = vmatprep.subr.bf16.mxu1 %v2140_v31  ;;  %s1678_s11 = sshll.u32 %s2248_s6, 4  ;;  %s1679_s11 = int_to_ptr.vmem [resolvable:$true] %s1678_s11 }
 0x10b   :  { %s2208_s12 = scalar_lea.vmem %s1679_s11, 64  ;;  %p2213_p2 = scmp.lt.s32.totalorder %s1679_s11, %s1679_s11 }
 0x10c   :  { %p2209_p1 = scmp.ne.s32.totalorder %s1679_s11, %s2208_s12  ;;  %p2214_p3 = scmp.lt.s32.totalorder %s2208_s12, %s2208_s12 }
 0x10d   :  { %1868 = vmatpush3.bf16.msra.mxu0 %v2125_v22  ;;  %1890 = vmatpush3.bf16.msra.mxu1 %v2141_v33 }
 0x10e   :  { %1869 = vmatprep.subr.bf16.mxu0 %v2126_v61  ;;  %1891 = vmatprep.subr.bf16.mxu1 %v2142_v34  ;;  %p2215_p4 = por %p2214_p3, %p2213_p2 }
 0x110   :  { %p2216_p5 = pnand %p2215_p4, %p2209_p1 }
 0x111   :  { %1870 = vmatpush3.bf16.msra.mxu0 %v2127_v24  ;;  %1892 = vmatpush3.bf16.msra.mxu1 %v2143_v35 }
 0x112   :  { %1871 = vmatprep.subr.bf16.mxu0 %v2128_v25  ;;  %1893 = vmatprep.subr.bf16.mxu1 %v2144_v36 }
 0x115   :  { %1872 = vmatpush3.bf16.msra.mxu0 %v2129_v28  ;;  %1894 = vmatpush3.bf16.msra.mxu1 %v2145_v37  ;;  %v1654_v37 = vand.u32 127, %v80_v12 }
 0x116   :  { %1873 = vmatprep.subr.bf16.mxu0 %v2130_v29  ;;  %1895 = vmatprep.subr.bf16.mxu1 %v2146_v38 }
 0x119   :  { %1874 = vmatpush3.bf16.msra.mxu0 %v2131_v32  ;;  %1896 = vmatpush3.bf16.msra.mxu1 %v2147_v39 }
 0x17c   :  { %v1108_v46 = vpop.f32.mrf.mxu0  ;;  %v1149_v47 = vpop.f32.mrf.mxu1 }
 0x17d   :  { %v1150_v48 = vadd.f32 %v1149_v47, %v1108_v46 }
 0x17e   :  { %v1110_v50 = vpop.f32.mrf.mxu0  ;;  %v1151_v51 = vpop.f32.mrf.mxu1 }
 0x17f   :  { %v1238_v52 = vpack.c.bf16 %v1150_v48, %v1150_v48  ;;  %v1152_v53 = vadd.f32 %v1151_v51, %v1110_v50 }
 0x180   :  { %v1112_v55 = vpop.f32.mrf.mxu0  ;;  %v1153_v56 = vpop.f32.mrf.mxu1 }
 0x181   :  { %v1239_v57 = vpack.c.bf16 %v1152_v53, %v1152_v53  ;;  %v1296_v62 = vadd.bf16 %v1274_v49, %v1238_v52 }
 0x182   :  { %v1113_v63 = vpop.f32.mrf.mxu0  ;;  %v1154_v1 = vpop.f32.mrf.mxu1 }
 0x183   :  { %v1297_v17 = vadd.bf16 %v1281_v54, %v1239_v57  ;;  %v1300_v58 = vmax.bf16 %v2241_v0, %v1296_v62 }
 0x185   :  { %v1301_v2 = vmax.bf16 %v2241_v0, %v1297_v17 }
 0x187   :  { %1599 = vmatprep.mubr.bf16.mxu0 %v1301_v2 }
 0x188   :  { %1600 = vmatmul.mubr.bf16.vlgmr.msra.gmra.mxu0 %v1300_v58 }
 0x1bc   :  { %v1190_v6 = vpop.f32.mrf.mxu0  ;;  %v1231_v7 = vpop.f32.mrf.mxu1 }
 0x1bd   :  { %v1232_v8 = vadd.f32 %v1231_v7, %v1190_v6 }
 0x1be   :  { %v1192_v10 = vpop.f32.mrf.mxu0  ;;  %v1233_v11 = vpop.f32.mrf.mxu1 }
 0x1bf   :  { %v1240_v13 = vpack.c.bf16 %v1232_v8, %v1232_v8  ;;  %v1234_v14 = vadd.f32 %v1233_v11, %v1192_v10 }
 0x1c0   :  { %v1194_v16 = vpop.f32.mrf.mxu0  ;;  %v1235_v19 = vpop.f32.mrf.mxu1 }
 0x1c1   :  { %v1241_v20 = vpack.c.bf16 %v1234_v14, %v1234_v14  ;;  %v1298_v21 = vadd.bf16 %v1288_v9, %v1240_v13 }
 0x1c2   :  { %v1195_v22 = vpop.f32.mrf.mxu0  ;;  %v1236_v61 = vpop.f32.mrf.mxu1 }
 0x1c3   :  { %v1299_v4 = vadd.bf16 %v1295_v15, %v1241_v20  ;;  %v1302_v24 = vmax.bf16 %v2241_v0, %v1298_v21 }
 0x1c5   :  { %v1303_v23 = vmax.bf16 %v2241_v0, %v1299_v4 }
 0x1c7   :  { %1639 = vmatprep.mubr.bf16.mxu1 %v1303_v23 }
 0x1c8   :  { %1640 = vmatmul.mubr.bf16.vlgmr.msra.gmra.mxu1 %v1302_v24 }
 0x248   :  { %v1875_v25 = vpop.f32.mrf.mxu0 }
 0x24a   :  { %v1876_v26 = vpop.f32.mrf.mxu0 }
 0x24b   :  { %v1877_v29 = vadd.f32 %v1876_v26, %v1875_v25 }
 0x24c   :  { %v1878_v27 = vpop.f32.mrf.mxu0 }
 0x24d   :  { %v1602_v32 = vadd.f32 %v1877_v29, %v1826_v18 }
 0x24e   :  { %v1879_v28 = vpop.f32.mrf.mxu0 }
 0x288   :  { %v1897_v30 = vpop.f32.mrf.mxu1 }
 0x28a   :  { %v1898_v31 = vpop.f32.mrf.mxu1 }
 0x28b   :  { %v1899_v33 = vadd.f32 %v1898_v31, %v1897_v30 }
 0x28c   :  { %v1900_v34 = vpop.f32.mrf.mxu1 }
 0x28d   :  { %v1642_v35 = vadd.f32 %v1899_v33, %v1602_v32 }
 0x28e   :  { %v1901_v36 = vpop.f32.mrf.mxu1 }
 0x28f   :  { %1649 = vmax.xlane.f32.xlu1 %v1642_v35  ;;  %v1647_v0 = vpack.c.bf16 %v1642_v35, %v1642_v35 }
 0x291   :  { %1648 = vst [vmem:[#allocation8] sm:$0xf] %v1647_v0 }
 0x318   :  { %v1650_v38 = vpop.xlane.xlu1 %1649 }
 0x319   :  { %1652 = vst.msk [vmem:[%s2443_s9] sm:$0xff] %vm1651_vm0, %v1650_v38  ;;  %vm1655_vm1 = vcmp.ge.f32.partialorder %v1642_v35, %v1650_v38 }
 0x31a   :  { %v1656_v39 = vsel %vm1655_vm1, %v1654_v37, 128 }
 0x31b   :  { %v1658_v40 = vshra.s32 %v1656_v39, 16  ;;  %v1657_v42 = vand.u32 65535, %v1656_v39 }
 0x31d   :  { %v1660_v41 = vcvt.s32.f32 %v1658_v40  ;;  %v1659_v44 = vcvt.s32.f32 %v1657_v42 }
 0x31f   :  { %1661 = vmin.xlane.f32.xlu0 %v1660_v41 }
 0x3a8   :  { %v1662_v43 = vpop.xlane.xlu0 %1661 }
 0x3a9   :  { %vm1663_vm2 = vcmp.eq.f32.partialorder %v1660_v41, %v1662_v43 }
 0x3aa   :  { %v1664_v45 = vsel %vm1663_vm2, %v1659_v44, inf }
 0x3ab   :  { %1665 = vmin.xlane.f32.xlu1 %v1664_v45 }
 0x3ac   :  { %2219 = shalt.err (!%p2216_p5)
}
 0x3ad   :  { %1681 = dma.vmem_to_hbm [thread:$0]  %s1679_s11, 64, %s2441_s7, [#allocation4]   ;;  %v1668_v12 = vcvt.f32.s32 %v1662_v43 }
 0x3af   :  { %v1669_v47 = vshll.u32 %v1668_v12, 16 }
 0x434   :  { %v1666_v46 = vpop.xlane.xlu1 %1665 }
 0x435   :  { %v1667_v48 = vcvt.f32.s32 %v1666_v46 }
 0x437   :  { %v1670_v49 = vadd.s32 %v1669_v47, %v1667_v48 }
 0x439   :  { %1671 = vst.msk [vmem:[%s2442_s8] sm:$0xff] %vm1651_vm0, %v1670_v49 }
 0x43a   :  { %2232 = dma.done.wait [#allocation4], 64  }
 0x43b   :  { %2233 = vsyncadd [#allocation4], 4294967232 }
 0x43c   :  { %1693 = vsyncpa [#allocation3], 1 }
 0x43d   :  { %1694 = vsyncpa [#allocation6], 1 }
 0x43e   :  { %1695 = vsyncpa [#allocation4], 1 }

</bundles_post_ra>
